<compile_context>
chip_gen: v7x
topology: tpu7x:2x2x1
jax: 0.10.0
libtpu: 0.0.40
codegen_flags: <defaults>
</compile_context>

<pallas_src>
import functools

import jax
import jax.numpy as jnp
import numpy as np
from jax.experimental import pallas as pl
from jax.experimental.pallas import tpu as pltpu

LANE = 128


def _dice_bce_kernel(x_ref, t_ref, o_ref, inter_acc, pt_acc, bce_acc, *,
                     n_valid, tile_rows, acc_rows, blocks_per_core,
                     first_masked_block, needs_mask):
    c = pl.program_id(0)          # (possibly) 2-TensorCore "parallel" axis
    i = pl.program_id(1)          # sequential reduction axis

    @pl.when(i == 0)
    def _init():
        inter_acc[...] = jnp.zeros_like(inter_acc)
        pt_acc[...] = jnp.zeros_like(pt_acc)
        bce_acc[...] = jnp.zeros_like(bce_acc)

    def _fold(v):
        # Reduce the (tile_rows, 128) contribution to the (acc_rows, 128)
        # accumulator with a layout-preserving reshape + sum over the leading
        # axis (pure VPU vreg adds, no XLU work in the hot loop).
        if v.shape[0] == acc_rows:
            return v
        return v.reshape(-1, acc_rows, LANE).sum(axis=0)

    def _accumulate(apply_mask):
        x = x_ref[...].astype(jnp.float32)
        t = t_ref[...].astype(jnp.float32)

        # Shared-exp sigmoid / log-sigmoid: 3 EUP ops (exp, log, reciprocal).
        neg_abs = -jnp.abs(x)
        e = jnp.exp(neg_abs)                 # EUP
        one_pe = 1.0 + e
        l = jnp.log(one_pe)                  # EUP (== log1p(e) to ~6e-8 abs)
        r = 1.0 / one_pe                     # EUP reciprocal (+ NR refine)
        p = jnp.where(x >= 0.0, r, e * r)    # numerically stable sigmoid(x)

        # log(sigmoid(x)) / log(1 - sigmoid(x)) in logits form, with torch's
        # binary_cross_entropy behaviour restored: logs clamped at -100, and
        # once f32 sigmoid rounds to exactly 1.0 torch yields log(0) -> -100.
        log_p = jnp.maximum(-(l + jnp.maximum(-x, 0.0)), -100.0)
        log_1mp = jnp.where(p >= 1.0, -100.0,
                            jnp.maximum(-(l + jnp.maximum(x, 0.0)), -100.0))

        bce = -(t * log_p + (1.0 - t) * log_1mp)
        inter = p * t
        pt = p + t

        if apply_mask:
            # Flat-index mask covers: lane-pad tail, partial-row last block and
            # fully-dummy block slots on the short core (2-TC cdiv split).
            # int32 flat index is fine for n < 2^31 elements.
            block_idx = c * blocks_per_core + i
            base = block_idx * (tile_rows * LANE)
            row_ids = jax.lax.broadcasted_iota(jnp.int32, (tile_rows, LANE), 0)
            lane_ids = jax.lax.broadcasted_iota(jnp.int32, (tile_rows, LANE), 1)
            valid = (base + row_ids * LANE + lane_ids) < n_valid
            # Select (not multiply): unwritten/garbage rows may hold NaN/Inf.
            inter = jnp.where(valid, inter, 0.0)
            pt = jnp.where(valid, pt, 0.0)
            bce = jnp.where(valid, bce, 0.0)

        inter_acc[...] += _fold(inter)
        pt_acc[...] += _fold(pt)
        bce_acc[...] += _fold(bce)

    if needs_mask:
        block_idx = c * blocks_per_core + i
        masked = block_idx >= first_masked_block

        @pl.when(masked)
        def _masked():
            _accumulate(True)

        @pl.when(jnp.logical_not(masked))
        def _unmasked():
            _accumulate(False)
    else:
        _accumulate(False)

    @pl.when(i == pl.num_programs(1) - 1)
    def _finalize():
        o_ref[0, 0] = jnp.sum(inter_acc[...])   # sum(p * t)
        o_ref[0, 1] = jnp.sum(pt_acc[...])      # sum(p) + sum(t)
        o_ref[0, 2] = jnp.sum(bce_acc[...])     # sum of per-element BCE


def dice_bce_loss(inputs, targets, smooth=1.0, tile_rows=2048):
    n = int(np.prod(inputs.shape))
    assert int(np.prod(targets.shape)) == n

    # Keep caller dtype (bf16 stays bf16 across HBM->VMEM; f32 cast in-kernel).
    x = inputs.reshape(-1)
    t = targets.reshape(-1)

    rows = (n + LANE - 1) // LANE
    pad = rows * LANE - n
    if pad:
        # Only for n % 128 != 0 (lane remainder); aligned n reshapes for free.
        x = jnp.pad(x, (0, pad))
        t = jnp.pad(t, (0, pad))
    x = x.reshape(rows, LANE)
    t = t.reshape(rows, LANE)

    # Sublane-multiple tiles (32 covers f32 / bf16 / 8-bit packing).
    tile_rows = max(32, (int(tile_rows) // 32) * 32)

    if rows <= tile_rows:
        tile_rows_eff = rows            # single full-extent block (always legal)
        num_blocks = 1
    else:
        tile_rows_eff = tile_rows
        num_blocks = (rows + tile_rows_eff - 1) // tile_rows_eff

    # Always engage both TensorCores when there is >1 block (v7x has 2 TCs;
    # on v5e/v6e the size-2 "parallel" axis is just a harmless outer loop).
    num_cores = 2 if num_blocks >= 2 else 1
    blocks_per_core = (num_blocks + num_cores - 1) // num_cores
    total_slots = num_cores * blocks_per_core

    # First global block index that needs masking: the partial last real block
    # (lane tail / partial rows) and every dummy slot beyond it.
    if num_blocks * tile_rows_eff * LANE > n:
        first_masked_block = num_blocks - 1
    else:
        first_masked_block = num_blocks
    needs_mask = first_masked_block < total_slots

    # (8,128) accumulators when the tile folds cleanly; tile-sized only in the
    # tiny single-block case with rows % 8 != 0 (written once, so still cheap).
    acc_rows = 8 if tile_rows_eff % 8 == 0 else tile_rows_eff

    kernel = functools.partial(
        _dice_bce_kernel,
        n_valid=n,
        tile_rows=tile_rows_eff,
        acc_rows=acc_rows,
        blocks_per_core=blocks_per_core,
        first_masked_block=first_masked_block,
        needs_mask=needs_mask,
    )

    if total_slots > num_blocks:
        # Dummy slots on the short core re-read the last real block (valid
        # memory, fully masked out in-kernel) instead of an OOB DMA.
        def in_index(c, i):
            return (jnp.minimum(c * blocks_per_core + i, num_blocks - 1), 0)
    else:
        def in_index(c, i):
            return (c * blocks_per_core + i, 0)

    in_spec = pl.BlockSpec((tile_rows_eff, LANE), in_index)

    cost = pl.CostEstimate(
        flops=22 * n,
        transcendentals=3 * n,
        bytes_accessed=n * (x.dtype.itemsize + t.dtype.itemsize)
        + num_cores * 3 * 4)

    partials = pl.pallas_call(
        kernel,
        out_shape=jax.ShapeDtypeStruct((num_cores, 3), jnp.float32),
        grid=(num_cores, blocks_per_core),
        in_specs=[in_spec, in_spec],
        out_specs=pl.BlockSpec((1, 3), lambda c, i: (c, 0),
                               memory_space=pltpu.SMEM),
        scratch_shapes=[
            pltpu.VMEM((acc_rows, LANE), jnp.float32),  # sum of p*t
            pltpu.VMEM((acc_rows, LANE), jnp.float32),  # sum of p+t
            pltpu.VMEM((acc_rows, LANE), jnp.float32),  # sum of per-elem BCE
        ],
        compiler_params=pltpu.CompilerParams(
            dimension_semantics=("parallel", "arbitrary"),
            vmem_limit_bytes=32 * 1024 * 1024),
        cost_estimate=cost,
    )(x, t)

    intersection = jnp.sum(partials[:, 0])
    pt_sum = jnp.sum(partials[:, 1])
    bce_sum = jnp.sum(partials[:, 2])

    dice_loss = 1.0 - (2.0 * intersection + smooth) / (pt_sum + smooth)
    bce = bce_sum / float(n)
    return bce + dice_loss


def _reference(inputs, targets, smooth=1.0):
    p = jax.nn.sigmoid(inputs.astype(jnp.float32)).reshape(-1)
    t = targets.astype(jnp.float32).reshape(-1)
    intersection = jnp.sum(p * t)
    dice = 1.0 - (2.0 * intersection + smooth) / (jnp.sum(p) + jnp.sum(t) + smooth)
    bce = jnp.mean(-(t * jnp.maximum(jnp.log(p), -100.0)
                     + (1.0 - t) * jnp.maximum(jnp.log(1.0 - p), -100.0)))
    return bce + dice


if __name__ == "__main__":
    key = jax.random.PRNGKey(0)

    # (shape, dtype, tile_rows):
    #   * primary small NCHW case (single aligned block),
    #   * non-128-aligned case (lane-tail mask),
    #   * multi-block even split (2-TC path, small accumulators),
    #   * odd block count (partial last block + dummy slot via clamped index_map),
    #   * bf16 passthrough (no wrapper upcast).
    cases = [
        ((2, 4, 16, 16), jnp.float32, 2048),
        ((2, 3, 17, 19), jnp.float32, 32),
        ((4, 8, 64, 64), jnp.float32, 256),
        ((4, 8, 64, 64), jnp.float32, 384),
        ((4, 8, 64, 64), jnp.bfloat16, 256),
    ]

    for shape, dtype, tr in cases:
        key, k1, k2 = jax.random.split(key, 3)
        inputs = jax.random.normal(k1, shape, dtype=jnp.float32).astype(dtype)
        targets = jax.random.bernoulli(k2, 0.5, shape).astype(dtype)

        loss = dice_bce_loss(inputs, targets, smooth=1.0, tile_rows=tr)
        jax.block_until_ready(loss)

        ref = _reference(inputs, targets, smooth=1.0)
        np.testing.assert_allclose(np.asarray(loss), np.asarray(ref),
                                   rtol=1e-4, atol=1e-5)

    print("KERNEL_OK")
</pallas_src>

<mosaic_0001>
module attributes {stable_mosaic.version = 11 : i64} {
  func.func @_dice_bce_kernel(%arg0: i32, %arg1: i32, %arg2: memref<16x128xf32, #tpu.memory_space<vmem>>, %arg3: memref<16x128xf32, #tpu.memory_space<vmem>>, %arg4: memref<1x3xf32, #tpu.memory_space<smem>>, %arg5: memref<8x128xf32, #tpu.memory_space<vmem>>, %arg6: memref<8x128xf32, #tpu.memory_space<vmem>>, %arg7: memref<8x128xf32, #tpu.memory_space<vmem>>) attributes {dimension_semantics = [#tpu.dimension_semantics<parallel>, #tpu.dimension_semantics<arbitrary>], iteration_bounds = array<i64: 1, 1>, scalar_prefetch = 0 : i64, scratch_operands = 3 : i64, tpu.core_type = #tpu.core_type<tc>, window_params = [{transform_indices = @transform_0, window_bounds = array<i64: 16, 128>}, {transform_indices = @transform_1, window_bounds = array<i64: 16, 128>}, {transform_indices = @transform_2, window_bounds = array<i64: 1, 3>}]} {
    %c0_i32 = arith.constant 0 : i32
    %0 = arith.cmpi eq, %arg1, %c0_i32 : i32
    %1 = arith.extui %0 : i1 to i32
    %c0_i32_0 = arith.constant 0 : i32
    %2 = arith.cmpi ne, %1, %c0_i32_0 : i32
    scf.if %2 {
      %cst_35 = arith.constant 0.000000e+00 : f32
      %65 = vector.broadcast %cst_35 : f32 to vector<8x128xf32>
      %c0_36 = arith.constant 0 : index
      %c0_37 = arith.constant 0 : index
      %66 = vector.load %arg5[%c0_36, %c0_37] : memref<8x128xf32, #tpu.memory_space<vmem>>, vector<8x128xf32>
      tpu.vector_store %arg5[%c0_36, %c0_37], %65 {strides = array<i32>} : memref<8x128xf32, #tpu.memory_space<vmem>>, vector<8x128xf32>,
      %cst_38 = arith.constant 0.000000e+00 : f32
      %67 = vector.broadcast %cst_38 : f32 to vector<8x128xf32>
      %c0_39 = arith.constant 0 : index
      %c0_40 = arith.constant 0 : index
      %68 = vector.load %arg6[%c0_39, %c0_40] : memref<8x128xf32, #tpu.memory_space<vmem>>, vector<8x128xf32>
      tpu.vector_store %arg6[%c0_39, %c0_40], %67 {strides = array<i32>} : memref<8x128xf32, #tpu.memory_space<vmem>>, vector<8x128xf32>,
      %cst_41 = arith.constant 0.000000e+00 : f32
      %69 = vector.broadcast %cst_41 : f32 to vector<8x128xf32>
      %c0_42 = arith.constant 0 : index
      %c0_43 = arith.constant 0 : index
      %70 = vector.load %arg7[%c0_42, %c0_43] : memref<8x128xf32, #tpu.memory_space<vmem>>, vector<8x128xf32>
      tpu.vector_store %arg7[%c0_42, %c0_43], %69 {strides = array<i32>} : memref<8x128xf32, #tpu.memory_space<vmem>>, vector<8x128xf32>,
    } else {
    }
    %c0 = arith.constant 0 : index
    %c0_1 = arith.constant 0 : index
    %3 = vector.load %arg2[%c0, %c0_1] : memref<16x128xf32, #tpu.memory_space<vmem>>, vector<16x128xf32>
    %c0_2 = arith.constant 0 : index
    %c0_3 = arith.constant 0 : index
    %4 = vector.load %arg3[%c0_2, %c0_3] : memref<16x128xf32, #tpu.memory_space<vmem>>, vector<16x128xf32>
    %5 = math.absf %3 : vector<16x128xf32>
    %cst = arith.constant 0.000000e+00 : f32
    %6 = vector.broadcast %cst : f32 to vector<16x128xf32>
    %7 = arith.subf %6, %5 : vector<16x128xf32>
    %8 = math.exp %7 : vector<16x128xf32>
    %cst_4 = arith.constant 1.000000e+00 : f32
    %9 = vector.broadcast %cst_4 : f32 to vector<16x128xf32>
    %10 = arith.addf %9, %8 : vector<16x128xf32>
    %11 = math.log %10 : vector<16x128xf32>
    %cst_5 = arith.constant 1.000000e+00 : f32
    %12 = vector.broadcast %cst_5 : f32 to vector<16x128xf32>
    %13 = arith.divf %12, %10 : vector<16x128xf32>
    %cst_6 = arith.constant 0.000000e+00 : f32
    %14 = vector.broadcast %cst_6 : f32 to vector<16x128xf32>
    %15 = arith.cmpf oge, %3, %14 : vector<16x128xf32>
    %16 = arith.mulf %8, %13 : vector<16x128xf32>
    %17 = arith.select %15, %13, %16 : vector<16x128xi1>, vector<16x128xf32>
    %cst_7 = arith.constant 0.000000e+00 : f32
    %18 = vector.broadcast %cst_7 : f32 to vector<16x128xf32>
    %19 = arith.subf %18, %3 : vector<16x128xf32>
    %cst_8 = arith.constant 0.000000e+00 : f32
    %20 = vector.broadcast %cst_8 : f32 to vector<16x128xf32>
    %21 = arith.maximumf %19, %20 : vector<16x128xf32>
    %22 = arith.addf %11, %21 : vector<16x128xf32>
    %cst_9 = arith.constant 0.000000e+00 : f32
    %23 = vector.broadcast %cst_9 : f32 to vector<16x128xf32>
    %24 = arith.subf %23, %22 : vector<16x128xf32>
    %cst_10 = arith.constant -1.000000e+02 : f32
    %25 = vector.broadcast %cst_10 : f32 to vector<16x128xf32>
    %26 = arith.maximumf %24, %25 : vector<16x128xf32>
    %cst_11 = arith.constant 1.000000e+00 : f32
    %27 = vector.broadcast %cst_11 : f32 to vector<16x128xf32>
    %28 = arith.cmpf oge, %17, %27 : vector<16x128xf32>
    %cst_12 = arith.constant 0.000000e+00 : f32
    %29 = vector.broadcast %cst_12 : f32 to vector<16x128xf32>
    %30 = arith.maximumf %3, %29 : vector<16x128xf32>
    %31 = arith.addf %11, %30 : vector<16x128xf32>
    %cst_13 = arith.constant 0.000000e+00 : f32
    %32 = vector.broadcast %cst_13 : f32 to vector<16x128xf32>
    %33 = arith.subf %32, %31 : vector<16x128xf32>
    %cst_14 = arith.constant -1.000000e+02 : f32
    %34 = vector.broadcast %cst_14 : f32 to vector<16x128xf32>
    %35 = arith.maximumf %33, %34 : vector<16x128xf32>
    %cst_15 = arith.constant -1.000000e+02 : f32
    %36 = vector.broadcast %cst_15 : f32 to vector<16x128xf32>
    %37 = arith.select %28, %36, %35 : vector<16x128xi1>, vector<16x128xf32>
    %38 = arith.mulf %4, %26 : vector<16x128xf32>
    %cst_16 = arith.constant 1.000000e+00 : f32
    %39 = vector.broadcast %cst_16 : f32 to vector<16x128xf32>
    %40 = arith.subf %39, %4 : vector<16x128xf32>
    %41 = arith.mulf %40, %37 : vector<16x128xf32>
    %42 = arith.addf %38, %41 : vector<16x128xf32>
    %cst_17 = arith.constant 0.000000e+00 : f32
    %43 = vector.broadcast %cst_17 : f32 to vector<16x128xf32>
    %44 = arith.subf %43, %42 : vector<16x128xf32>
    %45 = arith.mulf %17, %4 : vector<16x128xf32>
    %46 = arith.addf %17, %4 : vector<16x128xf32>
    %c0_18 = arith.constant 0 : index
    %c0_19 = arith.constant 0 : index
    %47 = vector.load %arg5[%c0_18, %c0_19] : memref<8x128xf32, #tpu.memory_space<vmem>>, vector<8x128xf32>
    %48 = vector.shape_cast %45 : vector<16x128xf32> to vector<2x8x128xf32>
    %cst_20 = arith.constant dense<0.000000e+00> : vector<8x128xf32>
    %49 = vector.multi_reduction <add>, %48, %cst_20 [0] : vector<2x8x128xf32> to vector<8x128xf32>
    %50 = arith.addf %47, %49 : vector<8x128xf32>
    %c0_21 = arith.constant 0 : index
    %c0_22 = arith.constant 0 : index
    %51 = vector.load %arg5[%c0_21, %c0_22] : memref<8x128xf32, #tpu.memory_space<vmem>>, vector<8x128xf32>
    tpu.vector_store %arg5[%c0_21, %c0_22], %50 {strides = array<i32>} : memref<8x128xf32, #tpu.memory_space<vmem>>, vector<8x128xf32>,
    %c0_23 = arith.constant 0 : index
    %c0_24 = arith.constant 0 : index
    %52 = vector.load %arg6[%c0_23, %c0_24] : memref<8x128xf32, #tpu.memory_space<vmem>>, vector<8x128xf32>
    %53 = vector.shape_cast %46 : vector<16x128xf32> to vector<2x8x128xf32>
    %cst_25 = arith.constant dense<0.000000e+00> : vector<8x128xf32>
    %54 = vector.multi_reduction <add>, %53, %cst_25 [0] : vector<2x8x128xf32> to vector<8x128xf32>
    %55 = arith.addf %52, %54 : vector<8x128xf32>
    %c0_26 = arith.constant 0 : index
    %c0_27 = arith.constant 0 : index
    %56 = vector.load %arg6[%c0_26, %c0_27] : memref<8x128xf32, #tpu.memory_space<vmem>>, vector<8x128xf32>
    tpu.vector_store %arg6[%c0_26, %c0_27], %55 {strides = array<i32>} : memref<8x128xf32, #tpu.memory_space<vmem>>, vector<8x128xf32>,
    %c0_28 = arith.constant 0 : index
    %c0_29 = arith.constant 0 : index
    %57 = vector.load %arg7[%c0_28, %c0_29] : memref<8x128xf32, #tpu.memory_space<vmem>>, vector<8x128xf32>
    %58 = vector.shape_cast %44 : vector<16x128xf32> to vector<2x8x128xf32>
    %cst_30 = arith.constant dense<0.000000e+00> : vector<8x128xf32>
    %59 = vector.multi_reduction <add>, %58, %cst_30 [0] : vector<2x8x128xf32> to vector<8x128xf32>
    %60 = arith.addf %57, %59 : vector<8x128xf32>
    %c0_31 = arith.constant 0 : index
    %c0_32 = arith.constant 0 : index
    %61 = vector.load %arg7[%c0_31, %c0_32] : memref<8x128xf32, #tpu.memory_space<vmem>>, vector<8x128xf32>
    tpu.vector_store %arg7[%c0_31, %c0_32], %60 {strides = array<i32>} : memref<8x128xf32, #tpu.memory_space<vmem>>, vector<8x128xf32>,
    %c0_i32_33 = arith.constant 0 : i32
    %62 = arith.cmpi eq, %arg1, %c0_i32_33 : i32
    %63 = arith.extui %62 : i1 to i32
    %c0_i32_34 = arith.constant 0 : i32
    %64 = arith.cmpi ne, %63, %c0_i32_34 : i32
    scf.if %64 {
      %c0_35 = arith.constant 0 : index
      %c0_36 = arith.constant 0 : index
      %65 = vector.load %arg5[%c0_35, %c0_36] : memref<8x128xf32, #tpu.memory_space<vmem>>, vector<8x128xf32>
      %66 = vector.shape_cast %65 : vector<8x128xf32> to vector<1x8x128xf32>
      %cst_37 = arith.constant dense<0.000000e+00> : vector<1xf32>
      %67 = vector.multi_reduction <add>, %66, %cst_37 [1, 2] : vector<1x8x128xf32> to vector<1xf32>
      %68 = vector.shape_cast %67 : vector<1xf32> to vector<1x1x1xf32>
      %69 = vector.extract %68[0, 0, 0] : f32 from vector<1x1x1xf32>
      %c0_38 = arith.constant 0 : index
      %c0_39 = arith.constant 0 : index
      %70 = memref.load %arg4[%c0_38, %c0_39] : memref<1x3xf32, #tpu.memory_space<smem>>
      memref.store %69, %arg4[%c0_38, %c0_39] : memref<1x3xf32, #tpu.memory_space<smem>>
      %c0_40 = arith.constant 0 : index
      %c0_41 = arith.constant 0 : index
      %71 = vector.load %arg6[%c0_40, %c0_41] : memref<8x128xf32, #tpu.memory_space<vmem>>, vector<8x128xf32>
      %72 = vector.shape_cast %71 : vector<8x128xf32> to vector<1x8x128xf32>
      %cst_42 = arith.constant dense<0.000000e+00> : vector<1xf32>
      %73 = vector.multi_reduction <add>, %72, %cst_42 [1, 2] : vector<1x8x128xf32> to vector<1xf32>
      %74 = vector.shape_cast %73 : vector<1xf32> to vector<1x1x1xf32>
      %75 = vector.extract %74[0, 0, 0] : f32 from vector<1x1x1xf32>
      %c0_43 = arith.constant 0 : index
      %c1 = arith.constant 1 : index
      %76 = memref.load %arg4[%c0_43, %c1] : memref<1x3xf32, #tpu.memory_space<smem>>
      memref.store %75, %arg4[%c0_43, %c1] : memref<1x3xf32, #tpu.memory_space<smem>>
      %c0_44 = arith.constant 0 : index
      %c0_45 = arith.constant 0 : index
      %77 = vector.load %arg7[%c0_44, %c0_45] : memref<8x128xf32, #tpu.memory_space<vmem>>, vector<8x128xf32>
      %78 = vector.shape_cast %77 : vector<8x128xf32> to vector<1x8x128xf32>
      %cst_46 = arith.constant dense<0.000000e+00> : vector<1xf32>
      %79 = vector.multi_reduction <add>, %78, %cst_46 [1, 2] : vector<1x8x128xf32> to vector<1xf32>
      %80 = vector.shape_cast %79 : vector<1xf32> to vector<1x1x1xf32>
      %81 = vector.extract %80[0, 0, 0] : f32 from vector<1x1x1xf32>
      %c0_47 = arith.constant 0 : index
      %c2 = arith.constant 2 : index
      %82 = memref.load %arg4[%c0_47, %c2] : memref<1x3xf32, #tpu.memory_space<smem>>
      memref.store %81, %arg4[%c0_47, %c2] : memref<1x3xf32, #tpu.memory_space<smem>>
    } else {
    }
    return
  }
  func.func @transform_0(%arg0: i32, %arg1: i32) -> (i32, i32) {
    %c1_i32 = arith.constant 1 : i32
    %0 = arith.muli %arg0, %c1_i32 : i32
    %1 = arith.addi %0, %arg1 : i32
    %c0_i32 = arith.constant 0 : i32
    %c0_i32_0 = arith.constant 0 : i32
    return %1, %c0_i32 : i32, i32
  }
  func.func @transform_1(%arg0: i32, %arg1: i32) -> (i32, i32) {
    %c1_i32 = arith.constant 1 : i32
    %0 = arith.muli %arg0, %c1_i32 : i32
    %1 = arith.addi %0, %arg1 : i32
    %c0_i32 = arith.constant 0 : i32
    %c0_i32_0 = arith.constant 0 : i32
    return %1, %c0_i32 : i32, i32
  }
  func.func @transform_2(%arg0: i32, %arg1: i32) -> (i32, i32) {
    %c0_i32 = arith.constant 0 : i32
    %c0_i32_0 = arith.constant 0 : i32
    return %arg0, %c0_i32 : i32, i32
  }
}

</mosaic_0001>

<bundles_post_ra>
// kernel: tpu_custom_call.1
= control target key start
LH: loop header
LB: loop body
LE: loop exit
PB: predicated region body
PF: predicated region fallthrough
CT: control target
= control target key end

     0   :  { %7 = vsyncpa [#allocation6], 0  ;;  %s328_s0 = inlined_call_operand.hbm [shape: f32[16,128], index: 0, kind: input, shape index: {}]   ;;  %s329_s1 = inlined_call_operand.hbm [shape: f32[16,128], index: 1, kind: input, shape index: {}]   ;;  %s330_s2 = inlined_call_operand.hbm [shape: f32[1,3], index: 2, kind: output, shape index: {}]  }
   0x1   :  { %8 = vsyncpa [#allocation9], 0 }
   0x2   :  { %9 = vsyncpa [#allocation7], 0  ;;  %s272_s9 = smov [#allocation5]   ;;  %s212_s13 = scalar_lea.hbm %s328_s0, 256 }
   0x3   :  { %s19_s10 = sshll.u32 %s272_s9, 4  ;;  %p213_p0 = scmp.ne.s32.totalorder %s328_s0, %s212_s13  ;;  %s20_s10 = int_to_ptr.vmem [resolvable:$true] %s19_s10 }
   0x4   :  { %p216_p1 = scmp.lt.u32.totalorder %s212_s13, %s328_s0 }
   0x6   :  { %p218_p2 = pnand %p216_p1, %p213_p0 }
   0x8   :  { %221 = shalt.err (!%p218_p2)
}
   0x9   :  { %s222_s18 = scalar_lea.vmem %s20_s10, 256  ;;  %p227_p4 = scmp.lt.s32.totalorder %s20_s10, %s20_s10 }
   0xa   :  { %p223_p3 = scmp.ne.s32.totalorder %s20_s10, %s222_s18  ;;  %p228_p5 = scmp.lt.s32.totalorder %s222_s18, %s222_s18 }
   0xc   :  { %p229_p6 = por %p228_p5, %p227_p4 }
   0xe   :  { %p230_p7 = pnand %p229_p6, %p223_p3 }
  0x10   :  { %233 = shalt.err (!%p230_p7)
}
  0x11   :  { %s273_s19 = smov 128   ;;  %s274_s20 = smov 8  }
  0x12   :  { %25 = dma.hbm_to_vmem [thread:$0]  %s328_s0, 256, %s20_s10, [#allocation6], %s273_s19, %s273_s19, %s274_s20  }
  0x13   :  { %s275_s23 = smov [#allocation8]   ;;  %s234_s27 = scalar_lea.hbm %s329_s1, 256 }
  0x14   :  { %s35_s24 = sshll.u32 %s275_s23, 4  ;;  %p235_p8 = scmp.ne.s32.totalorder %s329_s1, %s234_s27  ;;  %s36_s24 = int_to_ptr.vmem [resolvable:$true] %s35_s24 }
  0x15   :  { %p238_p9 = scmp.lt.u32.totalorder %s234_s27, %s329_s1 }
  0x17   :  { %p240_p10 = pnand %p238_p9, %p235_p8 }
  0x19   :  { %243 = shalt.err (!%p240_p10)
}
  0x1a   :  { %s244_s4 = scalar_lea.vmem %s36_s24, 256  ;;  %p249_p12 = scmp.lt.s32.totalorder %s36_s24, %s36_s24 }
  0x1b   :  { %p245_p11 = scmp.ne.s32.totalorder %s36_s24, %s244_s4  ;;  %p250_p13 = scmp.lt.s32.totalorder %s244_s4, %s244_s4 }
  0x1d   :  { %p251_p0 = por %p250_p13, %p249_p12 }
  0x1f   :  { %p252_p1 = pnand %p251_p0, %p245_p11 }
  0x21   :  { %255 = shalt.err (!%p252_p1)
}
  0x22   :  { %41 = dma.hbm_to_vmem [thread:$0]  %s329_s1, 256, %s36_s24, [#allocation9], %s273_s19, %s273_s19, %s274_s20  }
  0x23   :  { %266 = dma.done.wait [#allocation6], 256  }
  0x24   :  { %267 = vsyncadd [#allocation6], 4294967040 }
  0x25   :  { %268 = dma.done.wait [#allocation9], 256  }
  0x26   :  { %269 = vsyncadd [#allocation9], 4294967040  ;;  %v59_v0 = vld [vmem:[#allocation5] sm:$0xff]  ;;  %v60_v1 = vld [vmem:[#allocation5 + $0x8] sm:$0xff]  ;;  %s256_s10 = scalar_lea.hbm %s330_s2, 16 }
  0x27   :  { %v63_v2 = vand.u32 2147483647, %v59_v0  ;;  %v64_v3 = vand.u32 2147483647, %v60_v1  ;;  %v87_v12 = vsub.f32 0.0, %v59_v0  ;;  %v88_v13 = vsub.f32 0.0, %v60_v1  ;;  %p257_p2 = scmp.ne.s32.totalorder %s330_s2, %s256_s10  ;;  %p260_p3 = scmp.lt.u32.totalorder %s256_s10, %s330_s2 }
  0x28   :  { %vm81_vm0 = vcmp.ge.f32.partialorder %v59_v0, 0.0  ;;  %v61_v16 = vld [vmem:[#allocation8] sm:$0xff]  ;;  %vm82_vm1 = vcmp.ge.f32.partialorder %v60_v1, 0.0  ;;  %v62_v20 = vld [vmem:[#allocation8 + $0x8] sm:$0xff]  ;;  %v99_v23 = vmax.f32 %v59_v0, 0.0  ;;  %v100_v24 = vmax.f32 %v60_v1, 0.0 }
  0x29   :  { %v65_v4 = vsub.f32 0.0, %v63_v2  ;;  %v66_v5 = vsub.f32 0.0, %v64_v3  ;;  %v89_v18 = vmax.f32 %v87_v12, 0.0  ;;  %v90_v22 = vmax.f32 %v88_v13, 0.0  ;;  %p262_p4 = pnand %p260_p3, %p257_p2 }
  0x2a   :  { %v111_v40 = vsub.f32 1.0, %v61_v16  ;;  %v112_v44 = vsub.f32 1.0, %v62_v20 }
  0x2b   :  { %v67_v6 = vmul.f32 1.442695, %v65_v4  ;;  %v69_v7 = vmul.f32 1.442695, %v66_v5 }
  0x2d   :  { %200 = vpow2.f32 %v67_v6 }
  0x2e   :  { %202 = vpow2.f32 %v69_v7 }
  0x37   :  { %v201_v8 = vpop.eup %200 }
  0x38   :  { %v203_v9 = vpop.eup %202  ;;  %v71_v10 = vadd.f32 1.0, %v201_v8 }
  0x39   :  { %v72_v11 = vadd.f32 1.0, %v203_v9 }
  0x3a   :  { %204 = vrcp.f32 %v71_v10 }
  0x3b   :  { %206 = vrcp.f32 %v72_v11 }
  0x3c   :  { %208 = vlog2.f32 %v71_v10 }
  0x3d   :  { %210 = vlog2.f32 %v72_v11 }
  0x44   :  { %v205_v14 = vpop.eup %204 }
  0x45   :  { %v207_v15 = vpop.eup %206  ;;  %v83_v17 = vmul.f32 %v205_v14, %v201_v8 }
  0x46   :  { %v209_v19 = vpop.eup %208  ;;  %v84_v21 = vmul.f32 %v207_v15, %v203_v9 }
  0x47   :  { %v211_v25 = vpop.eup %210  ;;  %v85_v26 = vsel %vm81_vm0, %v205_v14, %v83_v17  ;;  %v74_v27 = vmul.f32 0.6931472, %v209_v19 }
  0x48   :  { %v86_v28 = vsel %vm82_vm1, %v207_v15, %v84_v21  ;;  %v119_v29 = vmul.f32 %v85_v26, %v61_v16  ;;  %v76_v30 = vmul.f32 0.6931472, %v211_v25  ;;  %v121_v32 = vadd.f32 %v85_v26, %v61_v16 }
  0x49   :  { %v120_v31 = vmul.f32 %v86_v28, %v62_v20  ;;  %v122_v33 = vadd.f32 %v86_v28, %v62_v20  ;;  %v91_v34 = vadd.f32 %v89_v18, %v74_v27  ;;  %v101_v36 = vadd.f32 %v99_v23, %v74_v27 }
  0x4a   :  { %v92_v35 = vadd.f32 %v90_v22, %v76_v30  ;;  %v102_v37 = vadd.f32 %v100_v24, %v76_v30  ;;  %vm97_vm2 = vcmp.ge.f32.partialorder %v85_v26, 1.0  ;;  %vm98_vm3 = vcmp.ge.f32.partialorder %v86_v28, 1.0 }
  0x4b   :  { %v124_v38 = vadd.f32 %v120_v31, %v119_v29  ;;  %v93_v39 = vsub.f32 0.0, %v91_v34  ;;  %v103_v42 = vsub.f32 0.0, %v101_v36  ;;  %v128_v45 = vadd.f32 %v122_v33, %v121_v32 }
  0x4c   :  { %v94_v41 = vsub.f32 0.0, %v92_v35  ;;  %v104_v43 = vsub.f32 0.0, %v102_v37 }
  0x4d   :  { %139 = vadd.xlane.f32.xlu0 %v124_v38  ;;  %v95_v46 = vmax.f32 %v93_v39, -100.0  ;;  %v105_v48 = vmax.f32 %v103_v42, -100.0 }
  0x4e   :  { %v96_v47 = vmax.f32 %v94_v41, -100.0  ;;  %v106_v49 = vmax.f32 %v104_v43, -100.0 }
  0x4f   :  { %v109_v50 = vmul.f32 %v95_v46, %v61_v16  ;;  %v107_v51 = vsel %vm97_vm2, -100.0, %v105_v48 }
  0x50   :  { %v108_v52 = vsel %vm98_vm3, -100.0, %v106_v49  ;;  %v110_v53 = vmul.f32 %v96_v47, %v62_v20  ;;  %v113_v54 = vmul.f32 %v111_v40, %v107_v51 }
  0x51   :  { %151 = vadd.xlane.f32.xlu0 %v128_v45  ;;  %v114_v55 = vmul.f32 %v112_v44, %v108_v52 }
  0x52   :  { %v115_v56 = vadd.f32 %v113_v54, %v109_v50 }
  0x53   :  { %v116_v57 = vadd.f32 %v114_v55, %v110_v53 }
  0x54   :  { %v117_v58 = vsub.f32 0.0, %v115_v56 }
  0x55   :  { %v118_v59 = vsub.f32 0.0, %v116_v57 }
  0x57   :  { %v132_v60 = vadd.f32 %v118_v59, %v117_v58 }
  0x59   :  { %163 = vadd.xlane.f32.xlu1 %v132_v60 }
  0xda   :  { %v140_v61 = vpop.xlane.xlu0 %139 }
  0xdb   :  { %v141_v62 = vrot.slane %v140_v61, 4 }
  0xdd   :  { %v142_v63 = vadd.f32 %v141_v62, %v140_v61 }
  0xde   :  { %v152_v0 = vpop.xlane.xlu0 %151 }
  0xdf   :  { %v143_v1 = vrot.slane %v142_v63, 2  ;;  %v153_v2 = vrot.slane %v152_v0, 4 }
  0xe1   :  { %v154_v3 = vadd.f32 %v153_v2, %v152_v0  ;;  %v144_v4 = vadd.f32 %v143_v1, %v142_v63 }
  0xe3   :  { %v155_v5 = vrot.slane %v154_v3, 2  ;;  %v145_v6 = vrot.slane %v144_v4, 1 }
  0xe5   :  { %v156_v7 = vadd.f32 %v155_v5, %v154_v3  ;;  %v146_v8 = vadd.f32 %v145_v6, %v144_v4 }
  0xe6   :  { %v164_v9 = vpop.xlane.xlu1 %163 }
  0xe7   :  { %v165_v10 = vrot.slane %v164_v9, 4  ;;  %189 = vpush %v146_v8  ;;  %v157_v11 = vrot.slane %v156_v7, 1 }
  0xe9   :  { %v166_v12 = vadd.f32 %v165_v10, %v164_v9  ;;  %v158_v13 = vadd.f32 %v157_v11, %v156_v7 }
  0xeb   :  { %v167_v14 = vrot.slane %v166_v12, 2  ;;  %191 = vpush %v158_v13 }
  0xed   :  { %v168_v15 = vadd.f32 %v167_v14, %v166_v12 }
  0xef   :  { %v169_v16 = vrot.slane %v168_v15, 1 }
  0xf1   :  { %v170_v17 = vadd.f32 %v169_v16, %v168_v15 }
  0xf3   :  { %193 = vpush %v170_v17 }
 0x118   :  { %s190_s1 = spop %189 }
 0x119   :  { %149 = sst [smem:[#allocation10]] %s190_s1 }
 0x11c   :  { %s192_s6 = spop %191 }
 0x11d   :  { %161 = sst [smem:[#allocation10 + $0x1]] %s192_s6 }
 0x124   :  { %s194_s7 = spop %193 }
 0x125   :  { %173 = sst [smem:[#allocation10 + $0x2]] %s194_s7 }
 0x126   :  { %265 = shalt.err (!%p262_p4)
}
 0x127   :  { %s276_s15 = smov [#allocation10]  }
 0x128   :  { %181 = dma.smem_to_hbm %s276_s15, 16, %s330_s2, [#allocation7]  }
 0x129   :  { %270 = dma.done.wait [#allocation7], 16  }
 0x12a   :  { %271 = vsyncadd [#allocation7], 4294967280 }
 0x12b   :  { %185 = sfence }
 0x12c   :  { %186 = vsyncpa [#allocation6], 1 }
 0x12d   :  { %187 = vsyncpa [#allocation9], 1 }
 0x12e   :  { %188 = vsyncpa [#allocation7], 1 }

</bundles_post_ra>
